<compile_context>
chip_gen: v7x
topology: tpu7x:2x2x1
jax: 0.10.0
libtpu: 0.0.40
codegen_flags: <defaults>
</compile_context>

<pallas_src>
import jax
import jax.numpy as jnp
from jax.experimental import pallas as pl
from jax.experimental.pallas import tpu as pltpu

HIDDEN = 24


def dqn_kernel(xT_ref, w1_ref, b1_ref, w2_ref, b2_ref, w3_ref, b3_ref, oT_ref):
    """Feature-major fused MLP.

    xT_ref : (state_size, TILE_B)   bf16   (batch on lanes)
    w*_ref : (out, in)              bf16   (PyTorch layout, used directly)
    b*_ref : (out, 1)               f32
    oT_ref : (action_size, TILE_B)  f32
    """
    xT = xT_ref[...]                                                    # (S, Tb)
    # fc1 + ReLU -> (24, Tb), f32 accumulation on the MXU
    h1 = jnp.dot(w1_ref[...], xT, preferred_element_type=jnp.float32) + b1_ref[...]
    h1 = jnp.maximum(h1, 0.0).astype(xT.dtype)
    # fc2 + ReLU -> (24, Tb)
    h2 = jnp.dot(w2_ref[...], h1, preferred_element_type=jnp.float32) + b2_ref[...]
    h2 = jnp.maximum(h2, 0.0).astype(xT.dtype)
    # fc3 (no activation) -> (action_size, Tb)
    out = jnp.dot(w3_ref[...], h2, preferred_element_type=jnp.float32) + b3_ref[...]
    oT_ref[...] = out.astype(oT_ref.dtype)


def dqn_forward(x, params, *, tile_b_max=2048):
    """x: (B, state_size) f32.

    params: PyTorch-layout weights w1/w2/w3 of shape (out, in) and biases
            b1/b2/b3 of shape (out, 1), all f32.
    Returns (B, action_size) f32, matching DQN.forward.
    """
    B, state_size = x.shape
    action_size = params["w3"].shape[0]

    # Feature-major: batch on the lane axis; bf16 feed to the MXU.
    xT = x.T.astype(jnp.bfloat16)                       # (state_size, B)
    w1 = params["w1"].astype(jnp.bfloat16)
    w2 = params["w2"].astype(jnp.bfloat16)
    w3 = params["w3"].astype(jnp.bfloat16)
    b1, b2, b3 = params["b1"], params["b2"], params["b3"]  # f32, (out, 1)

    # Lane-dim tile: either the whole batch (single block), or a 128-multiple
    # chunk so the (8,128) block constraint and lane-dense stores hold.
    tile_b = B if B <= tile_b_max else tile_b_max
    grid = (pl.cdiv(B, tile_b),)

    vmem = pltpu.MemorySpace.VMEM
    # Weights/biases: whole array, same block every step -> stays VMEM-resident.
    resident = lambda a: pl.BlockSpec(a.shape, lambda i: (0, 0), memory_space=vmem)

    oT = pl.pallas_call(
        dqn_kernel,
        out_shape=jax.ShapeDtypeStruct((action_size, B), jnp.float32),
        grid=grid,
        in_specs=[
            pl.BlockSpec((state_size, tile_b), lambda i: (0, i), memory_space=vmem),
            resident(w1), resident(b1),
            resident(w2), resident(b2),
            resident(w3), resident(b3),
        ],
        out_specs=pl.BlockSpec((action_size, tile_b), lambda i: (0, i),
                               memory_space=vmem),
        compiler_params=pltpu.CompilerParams(
            dimension_semantics=("parallel",)),   # megacore sharding on v7x
    )(xT, w1, b1, w2, b2, w3, b3)

    return oT.T  # (B, action_size)


def init_params(key, state_size, action_size):
    """PyTorch nn.Linear default init: uniform(-1/sqrt(fan_in), 1/sqrt(fan_in)).

    Weights stored in PyTorch (out, in) layout; biases as (out, 1).
    """
    def linear(k, fan_in, fan_out):
        kw, kb = jax.random.split(k)
        bound = 1.0 / jnp.sqrt(jnp.float32(fan_in))
        w = jax.random.uniform(kw, (fan_out, fan_in), jnp.float32, -bound, bound)
        b = jax.random.uniform(kb, (fan_out, 1), jnp.float32, -bound, bound)
        return w, b

    k1, k2, k3 = jax.random.split(key, 3)
    w1, b1 = linear(k1, state_size, HIDDEN)
    w2, b2 = linear(k2, HIDDEN, HIDDEN)
    w3, b3 = linear(k3, HIDDEN, action_size)
    return {"w1": w1, "b1": b1, "w2": w2, "b2": b2, "w3": w3, "b3": b3}


def dqn_reference(x, p):
    """Pure-JAX f32 reference mirroring the PyTorch forward."""
    h1 = jnp.maximum(x @ p["w1"].T + p["b1"].T, 0.0)
    h2 = jnp.maximum(h1 @ p["w2"].T + p["b2"].T, 0.0)
    return h2 @ p["w3"].T + p["b3"].T


if __name__ == "__main__":
    key = jax.random.PRNGKey(0)
    k_params, k_x1, k_x2 = jax.random.split(key, 3)

    state_space_size = 8
    action_space_size = 4
    params = init_params(k_params, state_space_size, action_space_size)

    # bf16 feed -> compare against the f32 reference with a loose tolerance.
    TOL = dict(atol=5e-2, rtol=5e-2)

    # --- small-batch check (single block) ---
    batch = 2
    x = jax.random.normal(k_x1, (batch, state_space_size), jnp.float32)
    out = jax.block_until_ready(dqn_forward(x, params))
    ref = dqn_reference(x, params)
    assert out.shape == (batch, action_space_size)
    assert jnp.allclose(out, ref, **TOL), "mismatch vs reference (small batch)"

    # --- multi-step grid check (partial last tile, weight-resident specs) ---
    batch_big = 320  # 3 grid steps at tile_b=128, last tile partial
    x_big = jax.random.normal(k_x2, (batch_big, state_space_size), jnp.float32)
    out_big = jax.block_until_ready(dqn_forward(x_big, params, tile_b_max=128))
    ref_big = dqn_reference(x_big, params)
    assert out_big.shape == (batch_big, action_space_size)
    assert jnp.allclose(out_big, ref_big, **TOL), "mismatch vs reference (tiled batch)"

    print("KERNEL_OK")
</pallas_src>

<mosaic_0001>
module attributes {stable_mosaic.version = 11 : i64} {
  func.func @dqn_kernel(%arg0: i32, %arg1: memref<8x2xbf16, #tpu.memory_space<vmem>>, %arg2: memref<24x8xbf16, #tpu.memory_space<vmem>>, %arg3: memref<24x1xf32, #tpu.memory_space<vmem>>, %arg4: memref<24x24xbf16, #tpu.memory_space<vmem>>, %arg5: memref<24x1xf32, #tpu.memory_space<vmem>>, %arg6: memref<4x24xbf16, #tpu.memory_space<vmem>>, %arg7: memref<4x1xf32, #tpu.memory_space<vmem>>, %arg8: memref<4x2xf32, #tpu.memory_space<vmem>>) attributes {dimension_semantics = [#tpu.dimension_semantics<parallel>], iteration_bounds = array<i64: 1>, scalar_prefetch = 0 : i64, scratch_operands = 0 : i64, tpu.core_type = #tpu.core_type<tc>, window_params = [{transform_indices = @transform_0, window_bounds = array<i64: 8, 2>}, {pipeline_mode = #tpu.pipeline_mode<synchronous>, transform_indices = @transform_1, window_bounds = array<i64: 24, 8>}, {pipeline_mode = #tpu.pipeline_mode<synchronous>, transform_indices = @transform_2, window_bounds = array<i64: 24, 1>}, {pipeline_mode = #tpu.pipeline_mode<synchronous>, transform_indices = @transform_3, window_bounds = array<i64: 24, 24>}, {pipeline_mode = #tpu.pipeline_mode<synchronous>, transform_indices = @transform_4, window_bounds = array<i64: 24, 1>}, {pipeline_mode = #tpu.pipeline_mode<synchronous>, transform_indices = @transform_5, window_bounds = array<i64: 4, 24>}, {pipeline_mode = #tpu.pipeline_mode<synchronous>, transform_indices = @transform_6, window_bounds = array<i64: 4, 1>}, {transform_indices = @transform_7, window_bounds = array<i64: 4, 2>}]} {
    %c0 = arith.constant 0 : index
    %c0_0 = arith.constant 0 : index
    %0 = vector.load %arg1[%c0, %c0_0] : memref<8x2xbf16, #tpu.memory_space<vmem>>, vector<8x2xbf16>
    %c0_1 = arith.constant 0 : index
    %c0_2 = arith.constant 0 : index
    %1 = vector.load %arg2[%c0_1, %c0_2] : memref<24x8xbf16, #tpu.memory_space<vmem>>, vector<24x8xbf16>
    %cst = arith.constant dense<0.000000e+00> : vector<24x2xf32>
    %2 = tpu.matmul %1, %0, %cst {dimension_numbers = #tpu.dot_dimension_numbers<[1], [0], [0], [1], [0, 0, 1, 1], [], []>} : vector<24x8xbf16>, vector<8x2xbf16>, vector<24x2xf32> -> vector<24x2xf32>
    %c0_3 = arith.constant 0 : index
    %c0_4 = arith.constant 0 : index
    %3 = vector.load %arg3[%c0_3, %c0_4] : memref<24x1xf32, #tpu.memory_space<vmem>>, vector<24x1xf32>
    %4 = vector.broadcast %3 : vector<24x1xf32> to vector<24x2xf32>
    %5 = arith.addf %2, %4 : vector<24x2xf32>
    %cst_5 = arith.constant 0.000000e+00 : f32
    %6 = vector.broadcast %cst_5 : f32 to vector<24x2xf32>
    %7 = arith.maximumf %5, %6 : vector<24x2xf32>
    %8 = arith.truncf %7 : vector<24x2xf32> to vector<24x2xbf16>
    %c0_6 = arith.constant 0 : index
    %c0_7 = arith.constant 0 : index
    %9 = vector.load %arg4[%c0_6, %c0_7] : memref<24x24xbf16, #tpu.memory_space<vmem>>, vector<24x24xbf16>
    %cst_8 = arith.constant dense<0.000000e+00> : vector<24x2xf32>
    %10 = tpu.matmul %9, %8, %cst_8 {dimension_numbers = #tpu.dot_dimension_numbers<[1], [0], [0], [1], [0, 0, 1, 1], [], []>} : vector<24x24xbf16>, vector<24x2xbf16>, vector<24x2xf32> -> vector<24x2xf32>
    %c0_9 = arith.constant 0 : index
    %c0_10 = arith.constant 0 : index
    %11 = vector.load %arg5[%c0_9, %c0_10] : memref<24x1xf32, #tpu.memory_space<vmem>>, vector<24x1xf32>
    %12 = vector.broadcast %11 : vector<24x1xf32> to vector<24x2xf32>
    %13 = arith.addf %10, %12 : vector<24x2xf32>
    %cst_11 = arith.constant 0.000000e+00 : f32
    %14 = vector.broadcast %cst_11 : f32 to vector<24x2xf32>
    %15 = arith.maximumf %13, %14 : vector<24x2xf32>
    %16 = arith.truncf %15 : vector<24x2xf32> to vector<24x2xbf16>
    %c0_12 = arith.constant 0 : index
    %c0_13 = arith.constant 0 : index
    %17 = vector.load %arg6[%c0_12, %c0_13] : memref<4x24xbf16, #tpu.memory_space<vmem>>, vector<4x24xbf16>
    %cst_14 = arith.constant dense<0.000000e+00> : vector<4x2xf32>
    %18 = tpu.matmul %17, %16, %cst_14 {dimension_numbers = #tpu.dot_dimension_numbers<[1], [0], [0], [1], [0, 0, 1, 1], [], []>} : vector<4x24xbf16>, vector<24x2xbf16>, vector<4x2xf32> -> vector<4x2xf32>
    %c0_15 = arith.constant 0 : index
    %c0_16 = arith.constant 0 : index
    %19 = vector.load %arg7[%c0_15, %c0_16] : memref<4x1xf32, #tpu.memory_space<vmem>>, vector<4x1xf32>
    %20 = vector.broadcast %19 : vector<4x1xf32> to vector<4x2xf32>
    %21 = arith.addf %18, %20 : vector<4x2xf32>
    %c0_17 = arith.constant 0 : index
    %c0_18 = arith.constant 0 : index
    %22 = vector.load %arg8[%c0_17, %c0_18] : memref<4x2xf32, #tpu.memory_space<vmem>>, vector<4x2xf32>
    tpu.vector_store %arg8[%c0_17, %c0_18], %21 {strides = array<i32>} : memref<4x2xf32, #tpu.memory_space<vmem>>, vector<4x2xf32>,
    return
  }
  func.func @transform_0(%arg0: i32) -> (i32, i32) {
    %c0_i32 = arith.constant 0 : i32
    %c0_i32_0 = arith.constant 0 : i32
    return %c0_i32, %arg0 : i32, i32
  }
  func.func @transform_1(%arg0: i32) -> (i32, i32) {
    %c0_i32 = arith.constant 0 : i32
    %c0_i32_0 = arith.constant 0 : i32
    %c0_i32_1 = arith.constant 0 : i32
    return %c0_i32, %c0_i32_0 : i32, i32
  }
  func.func @transform_2(%arg0: i32) -> (i32, i32) {
    %c0_i32 = arith.constant 0 : i32
    %c0_i32_0 = arith.constant 0 : i32
    %c0_i32_1 = arith.constant 0 : i32
    return %c0_i32, %c0_i32_0 : i32, i32
  }
  func.func @transform_3(%arg0: i32) -> (i32, i32) {
    %c0_i32 = arith.constant 0 : i32
    %c0_i32_0 = arith.constant 0 : i32
    %c0_i32_1 = arith.constant 0 : i32
    return %c0_i32, %c0_i32_0 : i32, i32
  }
  func.func @transform_4(%arg0: i32) -> (i32, i32) {
    %c0_i32 = arith.constant 0 : i32
    %c0_i32_0 = arith.constant 0 : i32
    %c0_i32_1 = arith.constant 0 : i32
    return %c0_i32, %c0_i32_0 : i32, i32
  }
  func.func @transform_5(%arg0: i32) -> (i32, i32) {
    %c0_i32 = arith.constant 0 : i32
    %c0_i32_0 = arith.constant 0 : i32
    %c0_i32_1 = arith.constant 0 : i32
    return %c0_i32, %c0_i32_0 : i32, i32
  }
  func.func @transform_6(%arg0: i32) -> (i32, i32) {
    %c0_i32 = arith.constant 0 : i32
    %c0_i32_0 = arith.constant 0 : i32
    %c0_i32_1 = arith.constant 0 : i32
    return %c0_i32, %c0_i32_0 : i32, i32
  }
  func.func @transform_7(%arg0: i32) -> (i32, i32) {
    %c0_i32 = arith.constant 0 : i32
    %c0_i32_0 = arith.constant 0 : i32
    return %c0_i32, %arg0 : i32, i32
  }
}

</mosaic_0001>

<bundles_post_ra>
// kernel: tpu_custom_call.1
= control target key start
LH: loop header
LB: loop body
LE: loop exit
PB: predicated region body
PF: predicated region fallthrough
CT: control target
= control target key end

     0   :  { %vm64_vm0 = vcmask 1043456   ;;  %vm57_vm1 = vcmask 64512   ;;  %v324_v1 = vmov 0   ;;  %vm150_vm2 = vcmask 195584   ;;  %s419_s0 = inlined_call_operand.vmem [shape: bf16[8,2], index: 0, kind: input, shape index: {}]   ;;  %s420_s1 = inlined_call_operand.vmem [shape: bf16[24,8], index: 1, kind: input, shape index: {}]   ;;  %s421_s2 = inlined_call_operand.vmem [shape: f32[24,1], index: 2, kind: input, shape index: {}]   ;;  %s422_s4 = inlined_call_operand.vmem [shape: f32[24,1], index: 4, kind: input, shape index: {}]   ;;  %s423_s6 = inlined_call_operand.vmem [shape: f32[4,1], index: 6, kind: input, shape index: {}]   ;;  %s424_s3 = inlined_call_operand.vmem [shape: bf16[24,24], index: 3, kind: input, shape index: {}]   ;;  %s425_s5 = inlined_call_operand.vmem [shape: bf16[4,24], index: 5, kind: input, shape index: {}]   ;;  %s426_s7 = inlined_call_operand.vmem [shape: f32[4,2], index: 7, kind: output, shape index: {}]  }
   0x1   :  { %v27_v0 = vld [vmem:[%s419_s0] sm:$0xf]  ;;  %318 = vset.pattern.permute.xlu0 %v324_v1  ;;  %319 = vset.pattern.permute.xlu1 %v324_v1  ;;  %v321_v4 = vld [vmem:[%s420_s1 + $0x8] ss:$0 sps:$4 sm:$0xff]   ;;  %v33_v6 = vld [vmem:[%s421_s2 + $0x10] sm:$0xff]  ;;  %v325_v30 = vmov 0.0  }
   0x2   :  { %313 = vmatprep.subr.msk.bf16.mxu0 %vm64_vm0, %v27_v0  ;;  %v66_v2 = vsel %vm64_vm0, %v27_v0, 0  ;;  %v320_v3 = vld [vmem:[%s420_s1] sm:$0xff]   ;;  %v32_v7 = vld [vmem:[%s421_s2 + $0x8] sm:$0xff]  ;;  %46 = vperm.xlu1 %319, %v33_v6   ;;  %v126_v10 = vld [vmem:[%s422_s4 + $0x10] sm:$0xff]  ;;  %vm326_vm3 = vmmov 0   ;;  %vm266_vm4 = vcmask 11264  }
   0x3   :  { %292 = vmatpush3.bf16.msra.mxu0 %v66_v2  ;;  %v31_v5 = vld [vmem:[%s421_s2] sm:$0xff]  ;;  %293 = vmatprep.mubr.msk.bf16.mxu0 %vm57_vm1, %v320_v3  ;;  %v125_v9 = vld [vmem:[%s422_s4 + $0x8] sm:$0xff] }
   0x4   :  { %36 = vperm.xlu0 %318, %v31_v5   ;;  %v124_v8 = vld [vmem:[%s422_s4] sm:$0xff]  ;;  %v323_v29 = vld [vmem:[%s424_s3 + $0x8] ss:$0 sps:$4 sm:$0xff]   ;;  %305 = vmatprep.subr.bf16.mxu0 %v325_v30 }
   0x5   :  { %v214_v11 = vld [vmem:[%s423_s6] sm:$0xf] }
   0x6   :  { %294 = vmatmul.mubr.msk.bf16.vlgmr.msra.gmra.mrb[0].mxu0 %vm57_vm1, %v321_v4  ;;  %129 = vperm.xlu1 %319, %v124_v8   ;;  %v322_v12 = vld [vmem:[%s424_s3] sm:$0xff]  }
   0x7   :  { %301 = vmatprep.mubr.msk.bf16.mxu1 %vm150_vm2, %v322_v12  ;;  %309 = vmatprep.mubr.msk.bf16.mxu0 %vm326_vm3, %v325_v30  ;;  %v213_v47 = vld [vmem:[%s425_s5] sm:$0x3] }
   0x8   :  { %41 = vperm.xlu0 %318, %v32_v7  }
   0xa   :  { %139 = vperm.xlu1 %319, %v126_v10  }
   0xc   :  { %134 = vperm.xlu0 %318, %v125_v9  }
  0x10   :  { %217 = vperm.xlu0 %318, %v214_v11  }
  0x81   :  { %v47_v14 = vpop.permute.xlu1 %46 }
  0x83   :  { %v37_v13 = vpop.permute.xlu0 %36 }
  0x85   :  { %v130_v31 = vpop.permute.xlu1 %129 }
  0x87   :  { %v42_v20 = vpop.permute.xlu0 %41 }
  0x89   :  { %v140_v32 = vpop.permute.xlu1 %139 }
  0x8b   :  { %v135_v38 = vpop.permute.xlu0 %134 }
  0x8f   :  { %v218_v48 = vpop.permute.xlu0 %217 }
  0xd9   :  { %v295_v15 = vpop.f32.mrb[0].mxu0 }
  0xda   :  { %v102_v16 = vpop.f32.mrb[1].mxu0  ;;  %v111_v17 = vadd.f32 %v295_v15, %v47_v14 }
  0xdb   :  { %v103_v18 = vadd.f32 %v102_v16, %v37_v13  ;;  %v296_v19 = vpop.f32.mrb[2].mxu0 }
  0xdc   :  { %v105_v21 = vpop.f32.mrb[3].mxu0  ;;  %v118_v23 = vmax.f32 %v111_v17, 0.0 }
  0xdd   :  { %v106_v22 = vadd.f32 %v105_v21, %v42_v20  ;;  %v116_v24 = vmax.f32 %v103_v18, 0.0 }
  0xde   :  { %v120_v27 = vpack.c.bf16 %v118_v23, %v118_v23 }
  0xdf   :  { %v117_v25 = vmax.f32 %v106_v22, 0.0 }
  0xe0   :  { %v158_v28 = vsel %vm64_vm0, %v120_v27, 0 }
  0xe1   :  { %v119_v26 = vpack.c.bf16 %v117_v25, %v116_v24 }
  0xe3   :  { %297 = vmatprep.subr.bf16.mxu1 %v119_v26 }
  0xe4   :  { %298 = vmatpush3.bf16.msra.mxu1 %v119_v26 }
  0xe5   :  { %314 = vmatprep.subr.msk.bf16.mxu1 %vm64_vm0, %v120_v27 }
  0xe8   :  { %300 = vmatpush3.bf16.msra.mxu1 %v158_v28 }
  0xeb   :  { %302 = vmatmul.mubr.msk.bf16.vlgmr.msra.gmra.mrb[0].mxu1 %vm150_vm2, %v323_v29 }
 0x1be   :  { %v303_v33 = vpop.f32.mrb[0].mxu1 }
 0x1bf   :  { %v203_v34 = vadd.f32 %v303_v33, %v140_v32  ;;  %v194_v35 = vpop.f32.mrb[1].mxu1 }
 0x1c0   :  { %v195_v36 = vadd.f32 %v194_v35, %v130_v31  ;;  %v304_v37 = vpop.f32.mrb[2].mxu1 }
 0x1c1   :  { %v197_v39 = vpop.f32.mrb[3].mxu1  ;;  %v210_v41 = vmax.f32 %v203_v34, 0.0 }
 0x1c2   :  { %v198_v40 = vadd.f32 %v197_v39, %v135_v38  ;;  %v208_v42 = vmax.f32 %v195_v36, 0.0 }
 0x1c3   :  { %v212_v45 = vpack.c.bf16 %v210_v41, %v210_v41 }
 0x1c4   :  { %v209_v43 = vmax.f32 %v198_v40, 0.0 }
 0x1c5   :  { %v224_v46 = vsel %vm64_vm0, %v212_v45, 0 }
 0x1c6   :  { %v211_v44 = vpack.c.bf16 %v209_v43, %v208_v42 }
 0x1c8   :  { %306 = vmatpush3.bf16.msra.mxu0 %v211_v44 }
 0x1c9   :  { %307 = vmatprep.subr.bf16.mxu0 %v325_v30 }
 0x1cc   :  { %308 = vmatpush3.bf16.msra.mxu0 %v224_v46 }
 0x1cf   :  { %310 = vmatmul.mubr.msk.bf16.vlgmr.msra.gmra.mrb[4].mxu0 %vm150_vm2, %v213_v47 }
 0x2a2   :  { %v260_v49 = vpop.f32.mrb[4].mxu0 }
 0x2a3   :  { %v261_v50 = vadd.f32 %v260_v49, %v218_v48  ;;  %v311_v51 = vpop.f32.mrb[5].mxu0 }
 0x2a4   :  { %v263_v52 = vpop.f32.mrb[6].mxu0 }
 0x2a5   :  { %267 = vst.msk [vmem:[%s426_s7] sm:$0xf] %vm266_vm4, %v261_v50  ;;  %v312_v53 = vpop.f32.mrb[7].mxu0 }

</bundles_post_ra>
